<compile_context>
chip_gen: v5e
topology: v5e:2x2
jax: 0.10.0
libtpu: 0.0.40
codegen_flags: <defaults>
</compile_context>

<pallas_src>
import functools

import jax
import jax.numpy as jnp
from jax.experimental import pallas as pl
from jax.experimental.pallas import tpu as pltpu


HIDDEN = 128
IN_FEATURES = 2
OUT_FEATURES = 2
SUB_N = 128        # inner sub-chunk (bounds vreg live ranges); 128 on all generations
MAX_TILE_N = 2048  # batch-tile cap per grid step (amortizes per-step overhead)


def _elementwise_dtype():
    """bf16 elementwise (tanh / bias add) on v6e/v7x; f32 elsewhere (v5e has no bf16 VPU/EUP)."""
    try:
        kind = jax.devices()[0].device_kind.lower()
    except Exception:
        return jnp.float32
    if ("v6" in kind) or ("v7" in kind) or ("tpu7" in kind):
        return jnp.bfloat16
    return jnp.float32


def _choose_tile_n(n):
    """Largest tile <= MAX_TILE_N that still leaves >=2 grid steps when possible,
    so dimension_semantics=("parallel",) has work to split across cores."""
    total_chunks = max(1, -(-n // SUB_N))
    if total_chunks <= 1:
        return SUB_N
    chunks_per_tile = min(MAX_TILE_N // SUB_N, max(1, total_chunks // 2))
    return chunks_per_tile * SUB_N


def _uv_mlp_kernel(x_ref, a1c0_ref, a1c1_ref, c1_ref,
                   a2_ref, c2_ref, a3_ref, c3_ref, a4_ref, c4_ref,
                   o_ref, *, n_chunks, ew_dtype):
    """Transposed (features, batch) layout: x_ref (2, TILE_N), o_ref (2, TILE_N).

    Per SUB_N-wide chunk (sigmoid affine already folded into A*/c* by the wrapper):
        t1  = tanh(A1 x  + c1)      # layer 1 on the VPU (K=2), f32 accum
        t2  = tanh(A2 t1 + c2)      # bf16 MXU, f32 accum, ew_dtype elementwise
        t3  = tanh(A3 t2 + c3)
        out = softplus(A4 t3 + c4)  # f32 (softplus_relu == softplus since >= 0)
    """

    def compute_chunk(col):
        xc = x_ref[:, pl.ds(col, SUB_N)]                       # (2, SUB_N) f32

        # Layer 1 (K=2): VPU broadcast multiply-adds in f32; weight columns and bias
        # arrive pre-broadcast to (HIDDEN, SUB_N), so only the x rows broadcast here.
        z1 = (a1c0_ref[...] * xc[0:1, :]
              + a1c1_ref[...] * xc[1:2, :]
              + c1_ref[...])                                   # (128, SUB_N) f32
        h = jnp.tanh(z1.astype(ew_dtype))

        # Layers 2 & 3: bf16 MXU operands, f32 accumulation, ew_dtype elementwise.
        z2 = jnp.dot(a2_ref[...], h.astype(jnp.bfloat16),
                     preferred_element_type=jnp.float32)
        h = jnp.tanh(z2.astype(ew_dtype) + c2_ref[...])

        z3 = jnp.dot(a3_ref[...], h.astype(jnp.bfloat16),
                     preferred_element_type=jnp.float32)
        h = jnp.tanh(z3.astype(ew_dtype) + c3_ref[...])

        # Output layer + softplus, f32.
        z4 = jnp.dot(a4_ref[...], h.astype(jnp.bfloat16),
                     preferred_element_type=jnp.float32) + c4_ref[...]
        o_ref[:, pl.ds(col, SUB_N)] = jax.nn.softplus(z4).astype(o_ref.dtype)

    if n_chunks == 1:
        compute_chunk(0)
    else:
        def body(j, carry):
            compute_chunk(pl.multiple_of(j * SUB_N, SUB_N))
            return carry
        jax.lax.fori_loop(0, n_chunks, body, 0, unroll=n_chunks <= 4)


def _prep_params(params, ew_dtype, sub_n):
    """Fold the sigmoid affine into the weights and pre-broadcast loop-invariant pieces.

    sigmoid(z) = 0.5*tanh(0.5*z) + 0.5, and h = 0.5*t + 0.5 feeding W, b gives
    W h + b = (0.5 W) t + (0.5 W @ 1 + b).  Hence:
        A1 = 0.5  W1^T, c1 = 0.5 b1
        Ak = 0.25 Wk^T, ck = 0.25 Wk.sum(axis=0) + 0.5 bk     (k = 2, 3)
        A4 = 0.5  W4^T, c4 = 0.5 W4.sum(axis=0) + b4
    """
    w1, b1, w2, b2, w3, b3, w4, b4 = params
    f32 = jnp.float32

    a1 = 0.5 * w1.T.astype(f32)                                  # (128, 2) f32 (VPU layer)
    c1 = 0.5 * b1.reshape(-1).astype(f32)                        # (128,)
    a1c0 = jnp.broadcast_to(a1[:, 0:1], (HIDDEN, sub_n))
    a1c1 = jnp.broadcast_to(a1[:, 1:2], (HIDDEN, sub_n))
    c1b = jnp.broadcast_to(c1[:, None], (HIDDEN, sub_n))

    a2 = (0.25 * w2.T.astype(f32)).astype(jnp.bfloat16)          # (128, 128) bf16 (MXU)
    c2 = (0.25 * w2.astype(f32).sum(axis=0)
          + 0.5 * b2.reshape(-1).astype(f32)).astype(ew_dtype)
    c2b = jnp.broadcast_to(c2[:, None], (HIDDEN, sub_n))

    a3 = (0.25 * w3.T.astype(f32)).astype(jnp.bfloat16)          # (128, 128) bf16 (MXU)
    c3 = (0.25 * w3.astype(f32).sum(axis=0)
          + 0.5 * b3.reshape(-1).astype(f32)).astype(ew_dtype)
    c3b = jnp.broadcast_to(c3[:, None], (HIDDEN, sub_n))

    a4 = (0.5 * w4.T.astype(f32)).astype(jnp.bfloat16)           # (2, 128) bf16 (MXU)
    c4 = (0.5 * w4.astype(f32).sum(axis=0) + b4.reshape(-1).astype(f32))
    c4b = jnp.broadcast_to(c4[:, None], (OUT_FEATURES, sub_n))

    return a1c0, a1c1, c1b, a2, c2b, a3, c3b, a4, c4b


@jax.jit
def binn_diff_forward(inputs, params):
    """BINN_diff.forward(inputs) == uv_MLP(inputs). inputs: (N, 2) f32 -> (N, 2) f32."""
    n = inputs.shape[0]
    tile_n = _choose_tile_n(n)
    n_pad = -(-n // tile_n) * tile_n
    n_chunks = tile_n // SUB_N
    ew_dtype = _elementwise_dtype()

    # Lane-dense transposed layout: batch on lanes.
    # (If the surrounding pipeline adopts (features, batch) end-to-end these two
    #  transposes in the wrapper disappear for free.)
    x_t = inputs.T.astype(jnp.float32)                           # (2, n)
    if n_pad != n:
        x_t = jnp.pad(x_t, ((0, 0), (0, n_pad - n)))

    prep = _prep_params(params, ew_dtype, SUB_N)

    kernel = functools.partial(_uv_mlp_kernel, n_chunks=n_chunks, ew_dtype=ew_dtype)

    def _const_spec(shape):
        return pl.BlockSpec(shape, lambda i: (0,) * len(shape))

    out_t = pl.pallas_call(
        kernel,
        out_shape=jax.ShapeDtypeStruct((OUT_FEATURES, n_pad), jnp.float32),
        grid_spec=pltpu.PrefetchScalarGridSpec(
            num_scalar_prefetch=0,
            grid=(n_pad // tile_n,),
            in_specs=[pl.BlockSpec((IN_FEATURES, tile_n), lambda i: (0, i))]
                     + [_const_spec(p.shape) for p in prep],
            out_specs=pl.BlockSpec((OUT_FEATURES, tile_n), lambda i: (0, i)),
        ),
        compiler_params=pltpu.CompilerParams(
            dimension_semantics=("parallel",)),
    )(x_t, *prep)

    return out_t[:, :n].T


def init_params(key):
    """Deterministic init mimicking torch.nn.Linear default:
    U(-1/sqrt(fan_in), 1/sqrt(fan_in)) for both weight and bias."""
    layer_dims = [(IN_FEATURES, HIDDEN), (HIDDEN, HIDDEN),
                  (HIDDEN, HIDDEN), (HIDDEN, OUT_FEATURES)]
    params = []
    keys = jax.random.split(key, 2 * len(layer_dims))
    for li, (fan_in, fan_out) in enumerate(layer_dims):
        bound = 1.0 / jnp.sqrt(jnp.float32(fan_in))
        w = jax.random.uniform(keys[2 * li], (fan_in, fan_out),
                               minval=-bound, maxval=bound, dtype=jnp.float32)
        b = jax.random.uniform(keys[2 * li + 1], (1, fan_out),
                               minval=-bound, maxval=bound, dtype=jnp.float32)
        params.extend([w, b])
    return tuple(params)


def reference_forward(inputs, params):
    """Pure-JAX full-f32 reference in the ORIGINAL (unfolded) formulation."""
    w1, b1, w2, b2, w3, b3, w4, b4 = params
    h = jax.nn.sigmoid(inputs @ w1 + b1)
    h = jax.nn.sigmoid(h @ w2 + b2)
    h = jax.nn.sigmoid(h @ w3 + b3)
    return jax.nn.softplus(h @ w4 + b4)


if __name__ == "__main__":
    key = jax.random.PRNGKey(0)
    k_params, k_x, k_t = jax.random.split(key, 3)

    params = init_params(k_params)

    # BINN_diff consumes (x, t) pairs: x in [0, 10], t in [0, 24.5].
    N = 200
    x_col = jax.random.uniform(k_x, (N, 1), minval=0.0, maxval=10.0,
                               dtype=jnp.float32)
    t_col = jax.random.uniform(k_t, (N, 1), minval=0.0, maxval=24.5,
                               dtype=jnp.float32)
    inputs = jnp.concatenate([x_col, t_col], axis=1)  # (N, 2)

    out = binn_diff_forward(inputs, params)
    out = jax.block_until_ready(out)

    ref = reference_forward(inputs, params)
    assert out.shape == (N, 2)
    # bf16 MXU operands everywhere + bf16 elementwise on v6e/v7x -> loose tolerance
    # vs the full-f32 reference (still catches any algebra / layout bugs).
    assert jnp.allclose(out, ref, atol=1e-1, rtol=1e-1), "mismatch vs reference"

    print("KERNEL_OK")
</pallas_src>

<mosaic_0001>
module attributes {stable_mosaic.version = 11 : i64} {
  func.func @_uv_mlp_kernel(%arg0: i32, %arg1: memref<2x128xf32, #tpu.memory_space<vmem>>, %arg2: memref<128x128xf32, #tpu.memory_space<vmem>>, %arg3: memref<128x128xf32, #tpu.memory_space<vmem>>, %arg4: memref<128x128xf32, #tpu.memory_space<vmem>>, %arg5: memref<128x128xbf16, #tpu.memory_space<vmem>>, %arg6: memref<128x128xf32, #tpu.memory_space<vmem>>, %arg7: memref<128x128xbf16, #tpu.memory_space<vmem>>, %arg8: memref<128x128xf32, #tpu.memory_space<vmem>>, %arg9: memref<2x128xbf16, #tpu.memory_space<vmem>>, %arg10: memref<2x128xf32, #tpu.memory_space<vmem>>, %arg11: memref<2x128xf32, #tpu.memory_space<vmem>>) attributes {dimension_semantics = [#tpu.dimension_semantics<parallel>], iteration_bounds = array<i64: 2>, scalar_prefetch = 0 : i64, scratch_operands = 0 : i64, tpu.core_type = #tpu.core_type<tc>, window_params = [{transform_indices = @transform_0, window_bounds = array<i64: 2, 128>}, {pipeline_mode = #tpu.pipeline_mode<synchronous>, transform_indices = @transform_1, window_bounds = array<i64: 128, 128>}, {pipeline_mode = #tpu.pipeline_mode<synchronous>, transform_indices = @transform_2, window_bounds = array<i64: 128, 128>}, {pipeline_mode = #tpu.pipeline_mode<synchronous>, transform_indices = @transform_3, window_bounds = array<i64: 128, 128>}, {pipeline_mode = #tpu.pipeline_mode<synchronous>, transform_indices = @transform_4, window_bounds = array<i64: 128, 128>}, {pipeline_mode = #tpu.pipeline_mode<synchronous>, transform_indices = @transform_5, window_bounds = array<i64: 128, 128>}, {pipeline_mode = #tpu.pipeline_mode<synchronous>, transform_indices = @transform_6, window_bounds = array<i64: 128, 128>}, {pipeline_mode = #tpu.pipeline_mode<synchronous>, transform_indices = @transform_7, window_bounds = array<i64: 128, 128>}, {pipeline_mode = #tpu.pipeline_mode<synchronous>, transform_indices = @transform_8, window_bounds = array<i64: 2, 128>}, {pipeline_mode = #tpu.pipeline_mode<synchronous>, transform_indices = @transform_9, window_bounds = array<i64: 2, 128>}, {transform_indices = @transform_10, window_bounds = array<i64: 2, 128>}]} {
    %c0 = arith.constant 0 : index
    %c0_0 = arith.constant 0 : index
    %0 = vector.load %arg1[%c0, %c0_0] : memref<2x128xf32, #tpu.memory_space<vmem>>, vector<2x128xf32>
    %c0_1 = arith.constant 0 : index
    %c0_2 = arith.constant 0 : index
    %1 = vector.load %arg2[%c0_1, %c0_2] : memref<128x128xf32, #tpu.memory_space<vmem>>, vector<128x128xf32>
    %2 = vector.extract_strided_slice %0 {offsets = [0, 0], sizes = [1, 128], strides = [1, 1]} : vector<2x128xf32> to vector<1x128xf32>
    %3 = vector.broadcast %2 : vector<1x128xf32> to vector<128x128xf32>
    %4 = arith.mulf %1, %3 : vector<128x128xf32>
    %c0_3 = arith.constant 0 : index
    %c0_4 = arith.constant 0 : index
    %5 = vector.load %arg3[%c0_3, %c0_4] : memref<128x128xf32, #tpu.memory_space<vmem>>, vector<128x128xf32>
    %6 = vector.extract_strided_slice %0 {offsets = [1, 0], sizes = [1, 128], strides = [1, 1]} : vector<2x128xf32> to vector<1x128xf32>
    %7 = vector.broadcast %6 : vector<1x128xf32> to vector<128x128xf32>
    %8 = arith.mulf %5, %7 : vector<128x128xf32>
    %9 = arith.addf %4, %8 : vector<128x128xf32>
    %c0_5 = arith.constant 0 : index
    %c0_6 = arith.constant 0 : index
    %10 = vector.load %arg4[%c0_5, %c0_6] : memref<128x128xf32, #tpu.memory_space<vmem>>, vector<128x128xf32>
    %11 = arith.addf %9, %10 : vector<128x128xf32>
    %12 = math.tanh %11 : vector<128x128xf32>
    %c0_7 = arith.constant 0 : index
    %c0_8 = arith.constant 0 : index
    %13 = vector.load %arg5[%c0_7, %c0_8] : memref<128x128xbf16, #tpu.memory_space<vmem>>, vector<128x128xbf16>
    %14 = arith.truncf %12 : vector<128x128xf32> to vector<128x128xbf16>
    %cst = arith.constant dense<0.000000e+00> : vector<128x128xf32>
    %15 = tpu.matmul %13, %14, %cst {dimension_numbers = #tpu.dot_dimension_numbers<[1], [0], [0], [1], [0, 0, 1, 1], [], []>} : vector<128x128xbf16>, vector<128x128xbf16>, vector<128x128xf32> -> vector<128x128xf32>
    %c0_9 = arith.constant 0 : index
    %c0_10 = arith.constant 0 : index
    %16 = vector.load %arg6[%c0_9, %c0_10] : memref<128x128xf32, #tpu.memory_space<vmem>>, vector<128x128xf32>
    %17 = arith.addf %15, %16 : vector<128x128xf32>
    %18 = math.tanh %17 : vector<128x128xf32>
    %c0_11 = arith.constant 0 : index
    %c0_12 = arith.constant 0 : index
    %19 = vector.load %arg7[%c0_11, %c0_12] : memref<128x128xbf16, #tpu.memory_space<vmem>>, vector<128x128xbf16>
    %20 = arith.truncf %18 : vector<128x128xf32> to vector<128x128xbf16>
    %cst_13 = arith.constant dense<0.000000e+00> : vector<128x128xf32>
    %21 = tpu.matmul %19, %20, %cst_13 {dimension_numbers = #tpu.dot_dimension_numbers<[1], [0], [0], [1], [0, 0, 1, 1], [], []>} : vector<128x128xbf16>, vector<128x128xbf16>, vector<128x128xf32> -> vector<128x128xf32>
    %c0_14 = arith.constant 0 : index
    %c0_15 = arith.constant 0 : index
    %22 = vector.load %arg8[%c0_14, %c0_15] : memref<128x128xf32, #tpu.memory_space<vmem>>, vector<128x128xf32>
    %23 = arith.addf %21, %22 : vector<128x128xf32>
    %24 = math.tanh %23 : vector<128x128xf32>
    %c0_16 = arith.constant 0 : index
    %c0_17 = arith.constant 0 : index
    %25 = vector.load %arg9[%c0_16, %c0_17] : memref<2x128xbf16, #tpu.memory_space<vmem>>, vector<2x128xbf16>
    %26 = arith.truncf %24 : vector<128x128xf32> to vector<128x128xbf16>
    %cst_18 = arith.constant dense<0.000000e+00> : vector<2x128xf32>
    %27 = tpu.matmul %25, %26, %cst_18 {dimension_numbers = #tpu.dot_dimension_numbers<[1], [0], [0], [1], [0, 0, 1, 1], [], []>} : vector<2x128xbf16>, vector<128x128xbf16>, vector<2x128xf32> -> vector<2x128xf32>
    %c0_19 = arith.constant 0 : index
    %c0_20 = arith.constant 0 : index
    %28 = vector.load %arg10[%c0_19, %c0_20] : memref<2x128xf32, #tpu.memory_space<vmem>>, vector<2x128xf32>
    %29 = arith.addf %27, %28 : vector<2x128xf32>
    %cst_21 = arith.constant 0.000000e+00 : f32
    %30 = vector.broadcast %cst_21 : f32 to vector<2x128xf32>
    %31 = arith.maximumf %29, %30 : vector<2x128xf32>
    %32 = vector.broadcast %cst_21 : f32 to vector<2x128xf32>
    %33 = arith.subf %29, %32 : vector<2x128xf32>
    %34 = arith.cmpf one, %33, %33 : vector<2x128xf32>
    %35 = vector.broadcast %cst_21 : f32 to vector<2x128xf32>
    %36 = arith.addf %29, %35 : vector<2x128xf32>
    %37 = math.absf %33 : vector<2x128xf32>
    %cst_22 = arith.constant 0.000000e+00 : f32
    %38 = vector.broadcast %cst_22 : f32 to vector<2x128xf32>
    %39 = arith.subf %38, %37 : vector<2x128xf32>
    %40 = math.exp %39 : vector<2x128xf32>
    %41 = math.log1p %40 : vector<2x128xf32>
    %42 = arith.addf %31, %41 : vector<2x128xf32>
    %43 = arith.select %34, %36, %42 : vector<2x128xi1>, vector<2x128xf32>
    %c0_23 = arith.constant 0 : index
    %c0_24 = arith.constant 0 : index
    %44 = vector.load %arg11[%c0_23, %c0_24] : memref<2x128xf32, #tpu.memory_space<vmem>>, vector<2x128xf32>
    tpu.vector_store %arg11[%c0_23, %c0_24], %43 {strides = array<i32>} : memref<2x128xf32, #tpu.memory_space<vmem>>, vector<2x128xf32>,
    return
  }
  func.func @transform_0(%arg0: i32) -> (i32, i32) {
    %c0_i32 = arith.constant 0 : i32
    %c0_i32_0 = arith.constant 0 : i32
    return %c0_i32, %arg0 : i32, i32
  }
  func.func @transform_1(%arg0: i32) -> (i32, i32) {
    %c0_i32 = arith.constant 0 : i32
    %c0_i32_0 = arith.constant 0 : i32
    %c0_i32_1 = arith.constant 0 : i32
    return %c0_i32, %c0_i32_0 : i32, i32
  }
  func.func @transform_2(%arg0: i32) -> (i32, i32) {
    %c0_i32 = arith.constant 0 : i32
    %c0_i32_0 = arith.constant 0 : i32
    %c0_i32_1 = arith.constant 0 : i32
    return %c0_i32, %c0_i32_0 : i32, i32
  }
  func.func @transform_3(%arg0: i32) -> (i32, i32) {
    %c0_i32 = arith.constant 0 : i32
    %c0_i32_0 = arith.constant 0 : i32
    %c0_i32_1 = arith.constant 0 : i32
    return %c0_i32, %c0_i32_0 : i32, i32
  }
  func.func @transform_4(%arg0: i32) -> (i32, i32) {
    %c0_i32 = arith.constant 0 : i32
    %c0_i32_0 = arith.constant 0 : i32
    %c0_i32_1 = arith.constant 0 : i32
    return %c0_i32, %c0_i32_0 : i32, i32
  }
  func.func @transform_5(%arg0: i32) -> (i32, i32) {
    %c0_i32 = arith.constant 0 : i32
    %c0_i32_0 = arith.constant 0 : i32
    %c0_i32_1 = arith.constant 0 : i32
    return %c0_i32, %c0_i32_0 : i32, i32
  }
  func.func @transform_6(%arg0: i32) -> (i32, i32) {
    %c0_i32 = arith.constant 0 : i32
    %c0_i32_0 = arith.constant 0 : i32
    %c0_i32_1 = arith.constant 0 : i32
    return %c0_i32, %c0_i32_0 : i32, i32
  }
  func.func @transform_7(%arg0: i32) -> (i32, i32) {
    %c0_i32 = arith.constant 0 : i32
    %c0_i32_0 = arith.constant 0 : i32
    %c0_i32_1 = arith.constant 0 : i32
    return %c0_i32, %c0_i32_0 : i32, i32
  }
  func.func @transform_8(%arg0: i32) -> (i32, i32) {
    %c0_i32 = arith.constant 0 : i32
    %c0_i32_0 = arith.constant 0 : i32
    %c0_i32_1 = arith.constant 0 : i32
    return %c0_i32, %c0_i32_0 : i32, i32
  }
  func.func @transform_9(%arg0: i32) -> (i32, i32) {
    %c0_i32 = arith.constant 0 : i32
    %c0_i32_0 = arith.constant 0 : i32
    %c0_i32_1 = arith.constant 0 : i32
    return %c0_i32, %c0_i32_0 : i32, i32
  }
  func.func @transform_10(%arg0: i32) -> (i32, i32) {
    %c0_i32 = arith.constant 0 : i32
    %c0_i32_0 = arith.constant 0 : i32
    return %c0_i32, %arg0 : i32, i32
  }
}

</mosaic_0001>

<bundles_post_ra>
// kernel: binn_diff_forward.1
= control target key start
LH: loop header
LB: loop body
LE: loop exit
PB: predicated region body
PF: predicated region fallthrough
CT: control target
= control target key end

     0   :  { %s1163_s13 = smov 0   ;;  %s1539_s0 = inlined_call_operand.vmem [shape: f32[2,256], index: 0, kind: input, shape index: {}]   ;;  %s1540_s1 = inlined_call_operand.vmem [shape: f32[128,128], index: 1, kind: input, shape index: {}]   ;;  %s1541_s2 = inlined_call_operand.vmem [shape: f32[128,128], index: 2, kind: input, shape index: {}]   ;;  %s1542_s3 = inlined_call_operand.vmem [shape: f32[128,128], index: 3, kind: input, shape index: {}]   ;;  %s1543_s4 = inlined_call_operand.vmem [shape: bf16[128,128], index: 4, kind: input, shape index: {}]   ;;  %s1544_s5 = inlined_call_operand.vmem [shape: f32[128,128], index: 5, kind: input, shape index: {}]   ;;  %s1545_s6 = inlined_call_operand.vmem [shape: bf16[128,128], index: 6, kind: input, shape index: {}]   ;;  %s1546_s7 = inlined_call_operand.vmem [shape: f32[128,128], index: 7, kind: input, shape index: {}]   ;;  %s1547_s8 = inlined_call_operand.vmem [shape: bf16[2,128], index: 8, kind: input, shape index: {}]   ;;  %s1548_s9 = inlined_call_operand.vmem [shape: f32[2,128], index: 9, kind: input, shape index: {}]   ;;  %s1549_s10 = inlined_call_operand.vmem [shape: f32[2,256], index: 10, kind: output, shape index: {}]  }
   0x1 LB: > { %s887_s14 = sadd.s32 4294967295, %s1106_s13   ;;  %p891_p0 = scmp.ge.s32.totalorder %s1106_s13, 1  ;;  %s1106_s13 = sphi %s1163_s13, %s20_s13  }
   0x2   : > { %p311_p1 = scmp.lt.s32.totalorder %s1106_s13, 3 }
   0x4   : > { %p312_p2 = pnand %p891_p0, %p311_p1 }
   0x5   : > { %p347_p3 = scmp.lt.s32.totalorder (!%p312_p2), %s887_s14, 1 }
   0x6   : > { %315 = sbr.rel (%p312_p2) target bundleno = 683 (0x2ab), region = 60 }
   0xb   : > { %s1551_s14 = smov (!%p347_p3, %s887_s14), 1  ;;  %v370_v0 = vld [vmem:[%s1540_s1 + $0x70] sm:$0xff]  ;;  %v371_v1 = vld [vmem:[%s1540_s1 + $0x78] sm:$0xff]  ;;  %v368_v5 = vld [vmem:[%s1540_s1 + $0x60] sm:$0xff] }
   0xc   : > { %s892_s15 = sshll.u32 %s1551_s14, 1  ;;  %v403_v2 = vld [vmem:[%s1541_s2 + $0x70] sm:$0xff]  ;;  %v404_v4 = vld [vmem:[%s1541_s2 + $0x78] sm:$0xff]  ;;  %v369_v8 = vld [vmem:[%s1540_s1 + $0x68] sm:$0xff] }
   0xd   : > { %s350_s18 = scalar_lea.vmem %s1539_s0, %s892_s15  ;;  %v401_v9 = vld [vmem:[%s1541_s2 + $0x60] sm:$0xff]  ;;  %v402_v10 = vld [vmem:[%s1541_s2 + $0x68] sm:$0xff]  ;;  %v366_v11 = vld [vmem:[%s1540_s1 + $0x50] sm:$0xff]  ;;  %s354_s30 = scalar_lea.vmem %s1549_s10, %s892_s15 }
   0xe   : > { %v355_v3 = vld [vmem:[%s350_s18] sm:$0x3]  ;;  %v367_v12 = vld [vmem:[%s1540_s1 + $0x58] sm:$0xff]  ;;  %v452_v17 = vld [vmem:[%s1542_s3 + $0x70] sm:$0xff] }
   0xf   : > { %v1194_v6 = vperm.slane %v355_v3, 0  ;;  %v1196_v7 = vperm.slane %v355_v3, 1  ;;  %v399_v18 = vld [vmem:[%s1541_s2 + $0x50] sm:$0xff]  ;;  %v400_v19 = vld [vmem:[%s1541_s2 + $0x58] sm:$0xff]  ;;  %v364_v25 = vld [vmem:[%s1540_s1 + $0x40] sm:$0xff] }
  0x10   : > { %v453_v20 = vld [vmem:[%s1542_s3 + $0x78] sm:$0xff]  ;;  %v365_v26 = vld [vmem:[%s1540_s1 + $0x48] sm:$0xff]  ;;  %v450_v29 = vld [vmem:[%s1542_s3 + $0x60] sm:$0xff] }
  0x11   : > { %v387_v13 = vmul.f32 %v1194_v6, %v370_v0  ;;  %v388_v14 = vmul.f32 %v1194_v6, %v371_v1  ;;  %v420_v15 = vmul.f32 %v1196_v7, %v403_v2  ;;  %v421_v16 = vmul.f32 %v1196_v7, %v404_v4  ;;  %v451_v30 = vld [vmem:[%s1542_s3 + $0x68] sm:$0xff]  ;;  %v397_v37 = vld [vmem:[%s1541_s2 + $0x40] sm:$0xff]  ;;  %v362_v39 = vld [vmem:[%s1540_s1 + $0x30] sm:$0xff] }
  0x12   : > { %v385_v21 = vmul.f32 %v1194_v6, %v368_v5  ;;  %v386_v22 = vmul.f32 %v1194_v6, %v369_v8  ;;  %v418_v23 = vmul.f32 %v1196_v7, %v401_v9  ;;  %v419_v24 = vmul.f32 %v1196_v7, %v402_v10  ;;  %v398_v38 = vld [vmem:[%s1541_s2 + $0x48] sm:$0xff]  ;;  %v448_v42 = vld [vmem:[%s1542_s3 + $0x50] sm:$0xff]  ;;  %v449_v43 = vld [vmem:[%s1542_s3 + $0x58] sm:$0xff] }
  0x13   : > { %v436_v27 = vadd.f32 %v420_v15, %v387_v13  ;;  %v437_v28 = vadd.f32 %v421_v16, %v388_v14  ;;  %v383_v31 = vmul.f32 %v1194_v6, %v366_v11  ;;  %v384_v32 = vmul.f32 %v1194_v6, %v367_v12  ;;  %v363_v46 = vld [vmem:[%s1540_s1 + $0x38] sm:$0xff]  ;;  %v395_v51 = vld [vmem:[%s1541_s2 + $0x30] sm:$0xff]  ;;  %v360_v56 = vld [vmem:[%s1540_s1 + $0x20] sm:$0xff] }
  0x14   : > { %v434_v33 = vadd.f32 %v418_v23, %v385_v21  ;;  %v435_v34 = vadd.f32 %v419_v24, %v386_v22  ;;  %v416_v35 = vmul.f32 %v1196_v7, %v399_v18  ;;  %v417_v36 = vmul.f32 %v1196_v7, %v400_v19  ;;  %v396_v55 = vld [vmem:[%s1541_s2 + $0x38] sm:$0xff]  ;;  %v361_v57 = vld [vmem:[%s1540_s1 + $0x28] sm:$0xff]  ;;  %v446_v60 = vld [vmem:[%s1542_s3 + $0x40] sm:$0xff] }
  0x15   : > { %v468_v40 = vadd.f32 %v452_v17, %v436_v27  ;;  %v469_v41 = vadd.f32 %v453_v20, %v437_v28  ;;  %v381_v44 = vmul.f32 %v1194_v6, %v364_v25  ;;  %v382_v45 = vmul.f32 %v1194_v6, %v365_v26  ;;  %v447_v61 = vld [vmem:[%s1542_s3 + $0x48] sm:$0xff]  ;;  %v393_v2 = vld [vmem:[%s1541_s2 + $0x20] sm:$0xff]  ;;  %v444_v5 = vld [vmem:[%s1542_s3 + $0x30] sm:$0xff] }
  0x16   : > { %v466_v47 = vadd.f32 %v450_v29, %v434_v33  ;;  %v467_v48 = vadd.f32 %v451_v30, %v435_v34  ;;  %v432_v49 = vadd.f32 %v416_v35, %v383_v31  ;;  %v433_v50 = vadd.f32 %v417_v36, %v384_v32  ;;  %v394_v3 = vld [vmem:[%s1541_s2 + $0x28] sm:$0xff]  ;;  %v445_v13 = vld [vmem:[%s1542_s3 + $0x38] sm:$0xff]  ;;  %v358_v17 = vld [vmem:[%s1540_s1 + $0x10] sm:$0xff] }
  0x17   : > { %1000 = vtanh.f32 %v468_v40  ;;  %v414_v52 = vmul.f32 %v1196_v7, %v397_v37  ;;  %v415_v53 = vmul.f32 %v1196_v7, %v398_v38  ;;  %v379_v54 = vmul.f32 %v1194_v6, %v362_v39  ;;  %v391_v18 = vld [vmem:[%s1541_s2 + $0x10] sm:$0xff]  ;;  %v359_v21 = vld [vmem:[%s1540_s1 + $0x18] sm:$0xff]  ;;  %v442_v32 = vld [vmem:[%s1542_s3 + $0x20] sm:$0xff] }
  0x18   : > { %1002 = vtanh.f32 %v469_v41  ;;  %v464_v58 = vadd.f32 %v448_v42, %v432_v49  ;;  %v465_v59 = vadd.f32 %v449_v43, %v433_v50  ;;  %v380_v62 = vmul.f32 %v1194_v6, %v363_v46  ;;  %v392_v22 = vld [vmem:[%s1541_s2 + $0x18] sm:$0xff]  ;;  %v356_v35 = vld [vmem:[%s1540_s1] sm:$0xff]  ;;  %v443_v39 = vld [vmem:[%s1542_s3 + $0x28] sm:$0xff] }
  0x19   : > { %1004 = vtanh.f32 %v466_v47  ;;  %v430_v63 = vadd.f32 %v414_v52, %v381_v44  ;;  %v431_v0 = vadd.f32 %v415_v53, %v382_v45  ;;  %v412_v1 = vmul.f32 %v1196_v7, %v395_v51  ;;  %v389_v36 = vld [vmem:[%s1541_s2] sm:$0xff]  ;;  %v357_v40 = vld [vmem:[%s1540_s1 + $0x8] sm:$0xff]  ;;  %v440_v50 = vld [vmem:[%s1542_s3 + $0x10] sm:$0xff] }
  0x1a   : > { %1006 = vtanh.f32 %v467_v48  ;;  %v413_v4 = vmul.f32 %v1196_v7, %v396_v55  ;;  %v377_v8 = vmul.f32 %v1194_v6, %v360_v56  ;;  %v378_v9 = vmul.f32 %v1194_v6, %v361_v57  ;;  %v390_v41 = vld [vmem:[%s1541_s2 + $0x8] sm:$0xff] }
  0x1b   : > { %1008 = vtanh.f32 %v464_v58  ;;  %v462_v10 = vadd.f32 %v446_v60, %v430_v63  ;;  %v463_v11 = vadd.f32 %v447_v61, %v431_v0  ;;  %v428_v12 = vadd.f32 %v412_v1, %v379_v54  ;;  %v441_v54 = vld [vmem:[%s1542_s3 + $0x18] sm:$0xff] }
  0x1c   : > { %1010 = vtanh.f32 %v465_v59  ;;  %v429_v14 = vadd.f32 %v413_v4, %v380_v62  ;;  %v410_v15 = vmul.f32 %v1196_v7, %v393_v2  ;;  %v411_v16 = vmul.f32 %v1196_v7, %v394_v3  ;;  %v439_v62 = vld [vmem:[%s1542_s3 + $0x8] sm:$0xff] }
  0x1d   : > { %v1001_v19 = vpop.eup %1000  ;;  %v460_v20 = vadd.f32 %v444_v5, %v428_v12  ;;  %1012 = vtanh.f32 %v462_v10  ;;  %v375_v28 = vmul.f32 %v1194_v6, %v358_v17  ;;  %v408_v29 = vmul.f32 %v1196_v7, %v391_v18  ;;  %v962_v17 = vld [vmem:[%s1543_s4 + $0x10] sm:$0xff]  ;;  %v967_v18 = vld [vmem:[%s1543_s4 + $0x38] sm:$0xff] }
  0x1e   : > { %v1003_v23 = vpop.eup %1002  ;;  %v461_v24 = vadd.f32 %v445_v13, %v429_v14  ;;  %v426_v27 = vadd.f32 %v410_v15, %v377_v8  ;;  %1014 = vtanh.f32 %v463_v11  ;;  %v427_v31 = vadd.f32 %v411_v16, %v378_v9  ;;  %v960_v13 = vld [vmem:[%s1543_s4] sm:$0xff]  ;;  %v965_v14 = vld [vmem:[%s1543_s4 + $0x28] sm:$0xff]  ;;  %v966_v16 = vld [vmem:[%s1543_s4 + $0x30] sm:$0xff] }
  0x1f   : > { %v1005_v25 = vpop.eup %1004  ;;  %v509_v26 = vpack.c.bf16 %v1003_v23, %v1001_v19  ;;  %v376_v33 = vmul.f32 %v1194_v6, %v359_v21  ;;  %v409_v34 = vmul.f32 %v1196_v7, %v392_v22  ;;  %1016 = vtanh.f32 %v460_v20  ;;  %v961_v15 = vld [vmem:[%s1543_s4 + $0x8] sm:$0xff]  ;;  %v963_v19 = vld [vmem:[%s1543_s4 + $0x18] sm:$0xff]  ;;  %v964_v20 = vld [vmem:[%s1543_s4 + $0x20] sm:$0xff] }
  0x20   : > { %v1007_v30 = vpop.eup %1006  ;;  %1018 = vtanh.f32 %v461_v24  ;;  %v458_v43 = vadd.f32 %v442_v32, %v426_v27  ;;  %v424_v44 = vadd.f32 %v408_v29, %v375_v28  ;;  %v373_v45 = vmul.f32 %v1194_v6, %v356_v35  ;;  %v510_v22 = vld [vmem:[%s1544_s5] sm:$0xff] }
  0x21   : > { %v1009_v37 = vpop.eup %1008  ;;  %574 = vmatpush.bf16.msra.mxu0 %v509_v26  ;;  %976 = vmatpush.bf16.msra.mxu3 %v509_v26  ;;  %v508_v38 = vpack.c.bf16 %v1007_v30, %v1005_v25  ;;  %v406_v46 = vmul.f32 %v1196_v7, %v389_v36  ;;  %v459_v48 = vadd.f32 %v443_v39, %v427_v31  ;;  %v511_v25 = vld [vmem:[%s1544_s5 + $0x8] sm:$0xff] }
  0x22   : > { %v1011_v42 = vpop.eup %1010  ;;  %v425_v49 = vadd.f32 %v409_v34, %v376_v33  ;;  %v374_v51 = vmul.f32 %v1194_v6, %v357_v40  ;;  %v407_v52 = vmul.f32 %v1196_v7, %v390_v41  ;;  %1020 = vtanh.f32 %v458_v43  ;;  %v438_v6 = vld [vmem:[%s1542_s3] sm:$0xff]  ;;  %v525_v43 = vld [vmem:[%s1544_s5 + $0x78] sm:$0xff] }
  0x23   : > { %v1013_v47 = vpop.eup %1012  ;;  %v507_v53 = vpack.c.bf16 %v1011_v42, %v1009_v37  ;;  %v456_v57 = vadd.f32 %v440_v50, %v424_v44  ;;  %v422_v58 = vadd.f32 %v406_v46, %v373_v45  ;;  %1022 = vtanh.f32 %v459_v48  ;;  %v522_v40 = vld [vmem:[%s1544_s5 + $0x60] sm:$0xff]  ;;  %v523_v42 = vld [vmem:[%s1544_s5 + $0x68] sm:$0xff]  ;;  %v520_v46 = vld [vmem:[%s1544_s5 + $0x50] sm:$0xff] }
  0x24   : > { %v1015_v55 = vpop.eup %1014  ;;  %v457_v60 = vadd.f32 %v441_v54, %v425_v49  ;;  %v423_v61 = vadd.f32 %v407_v52, %v374_v51  ;;  %v521_v49 = vld [vmem:[%s1544_s5 + $0x58] sm:$0xff] }
  0x25   : > { %575 = vmatpush.bf16.msra.mxu0 %v508_v38  ;;  %977 = vmatpush.bf16.msra.mxu3 %v508_v38  ;;  %v1017_v56 = vpop.eup %1016  ;;  %v506_v7 = vpack.c.bf16 %v1015_v55, %v1013_v47  ;;  %1024 = vtanh.f32 %v456_v57  ;;  %v454_v63 = vadd.f32 %v438_v6, %v422_v58  ;;  %v524_v38 = vld [vmem:[%s1544_s5 + $0x70] sm:$0xff] }
  0x26   : > { %v1019_v59 = vpop.eup %1018  ;;  %1026 = vtanh.f32 %v457_v60  ;;  %v455_v0 = vadd.f32 %v439_v62, %v423_v61  ;;  %v518_v62 = vld [vmem:[%s1544_s5 + $0x40] sm:$0xff] }
  0x27   : > { %v505_v2 = vpack.c.bf16 %v1019_v59, %v1017_v56  ;;  %1028 = vtanh.f32 %v454_v63  ;;  %v517_v63 = vld [vmem:[%s1544_s5 + $0x38] sm:$0xff] }
  0x28   : > { %v1021_v1 = vpop.eup %1020  ;;  %1030 = vtanh.f32 %v455_v0 }
  0x29   : > { %576 = vmatpush.bf16.msra.mxu0 %v507_v53  ;;  %978 = vmatpush.bf16.msra.mxu3 %v507_v53  ;;  %v1023_v3 = vpop.eup %1022 }
  0x2a   : > { %v504_v5 = vpack.c.bf16 %v1023_v3, %v1021_v1  ;;  %v519_v1 = vld [vmem:[%s1544_s5 + $0x48] sm:$0xff] }
  0x2b   : > { %v1025_v4 = vpop.eup %1024 }
  0x2c   : > { %v1027_v8 = vpop.eup %1026 }
  0x2d   : > { %577 = vmatpush.bf16.msra.mxu0 %v506_v7  ;;  %979 = vmatpush.bf16.msra.mxu3 %v506_v7  ;;  %v1029_v9 = vpop.eup %1028  ;;  %v503_v10 = vpack.c.bf16 %v1027_v8, %v1025_v4  ;;  %v515_v8 = vld [vmem:[%s1544_s5 + $0x28] sm:$0xff] }
  0x2e   : > { %v1031_v11 = vpop.eup %1030 }
  0x2f   : > { %v502_v12 = vpack.c.bf16 %v1031_v11, %v1029_v9 }
  0x31   : > { %578 = vmatpush.bf16.msra.mxu0 %v505_v2  ;;  %980 = vmatpush.bf16.msra.mxu3 %v505_v2  ;;  %v516_v2 = vld [vmem:[%s1544_s5 + $0x30] sm:$0xff] }
  0x35   : > { %579 = vmatpush.bf16.msra.mxu0 %v504_v5  ;;  %981 = vmatpush.bf16.msra.mxu3 %v504_v5 }
  0x39   : > { %580 = vmatpush.bf16.msra.mxu0 %v503_v10  ;;  %982 = vmatpush.bf16.msra.mxu3 %v503_v10  ;;  %v514_v10 = vld [vmem:[%s1544_s5 + $0x20] sm:$0xff] }
  0x3d   : > { %581 = vmatpush.bf16.msra.mxu0 %v502_v12  ;;  %983 = vmatpush.bf16.msra.mxu3 %v502_v12  ;;  %v513_v12 = vld [vmem:[%s1544_s5 + $0x18] sm:$0xff] }
  0x40   : > { %582 = vmatmul.bf16.vlgmr.msra.gmra.mxu0 %v960_v13  ;;  %607 = vmatmul.bf16.vlgmr.msra.gmra.mxu3 %v965_v14 }
  0x50   : > { %587 = vmatmul.bf16.gmra.mxu0 %v961_v15  ;;  %612 = vmatmul.bf16.gmra.mxu3 %v966_v16  ;;  %v512_v15 = vld [vmem:[%s1544_s5 + $0x10] sm:$0xff] }
  0x60   : > { %592 = vmatmul.bf16.gmra.mxu0 %v962_v17  ;;  %617 = vmatmul.bf16.gmra.mxu3 %v967_v18 }
  0x70   : > { %597 = vmatmul.bf16.gmra.mxu0 %v963_v19 }
  0x80   : > { %602 = vmatmul.bf16.gmra.mxu0 %v964_v20 }
  0xbd   : > { %v583_v21 = vpop.f32.mrf.mxu0 }
  0xbe   : > { %v584_v23 = vadd.f32 %v583_v21, %v510_v22 }
  0xc0   : > { %1032 = vtanh.f32 %v584_v23 }
  0xc3   : > { %v608_v24 = vpop.f32.mrf.mxu3 }
  0xc4   : > { %v609_v51 = vadd.f32 %v608_v24, %v520_v46 }
  0xc5   : > { %v585_v26 = vpop.f32.mrf.mxu0 }
  0xc6   : > { %v586_v27 = vadd.f32 %v585_v26, %v511_v25  ;;  %v1033_v29 = vpop.eup %1032 }
  0xc8   : > { %1034 = vtanh.f32 %v586_v27 }
  0xcb   : > { %v610_v28 = vpop.f32.mrf.mxu3 }
  0xcc   : > { %v611_v52 = vadd.f32 %v610_v28, %v521_v49 }
  0xcd   : > { %v1389_v30 = vpop.f32.mrf.mxu0 }
  0xce   : > { %v1035_v31 = vpop.eup %1034  ;;  %v589_v20 = vadd.f32 %v1389_v30, %v512_v15  ;;  %v973_v30 = vld [vmem:[%s1545_s6 + $0x28] sm:$0xff] }
  0xcf   : > { %v1391_v32 = vpack.c.bf16 %v1035_v31, %v1033_v29  ;;  %v968_v29 = vld [vmem:[%s1545_s6] sm:$0xff]  ;;  %v969_v31 = vld [vmem:[%s1545_s6 + $0x8] sm:$0xff] }
  0xd3   : > { %v613_v33 = vpop.f32.mrf.mxu3 }
  0xd4   : > { %v614_v44 = vadd.f32 %v613_v33, %v522_v40  ;;  %v974_v33 = vld [vmem:[%s1545_s6 + $0x30] sm:$0xff] }
  0xd5   : > { %v1393_v34 = vpop.f32.mrf.mxu0 }
  0xd6   : > { %v591_v17 = vadd.f32 %v1393_v34, %v513_v12  ;;  %v970_v34 = vld [vmem:[%s1545_s6 + $0x10] sm:$0xff] }
  0xdb   : > { %v615_v35 = vpop.f32.mrf.mxu3 }
  0xdc   : > { %v616_v47 = vadd.f32 %v615_v35, %v523_v42  ;;  %v971_v35 = vld [vmem:[%s1545_s6 + $0x18] sm:$0xff] }
  0xdd   : > { %v593_v36 = vpop.f32.mrf.mxu0 }
  0xde   : > { %v594_v13 = vadd.f32 %v593_v36, %v514_v10  ;;  %v972_v36 = vld [vmem:[%s1545_s6 + $0x20] sm:$0xff] }
  0xe3   : > { %v618_v37 = vpop.f32.mrf.mxu3 }
  0xe4   : > { %v619_v41 = vadd.f32 %v618_v37, %v524_v38  ;;  %v663_v38 = vld [vmem:[%s1546_s7] sm:$0xff] }
  0xe5   : > { %v595_v39 = vpop.f32.mrf.mxu0 }
  0xe6   : > { %1036 = vtanh.f32 %v619_v41  ;;  %v596_v11 = vadd.f32 %v595_v39, %v515_v8  ;;  %v664_v41 = vld [vmem:[%s1546_s7 + $0x8] sm:$0xff] }
  0xeb   : > { %v620_v45 = vpop.f32.mrf.mxu3 }
  0xec   : > { %v621_v48 = vadd.f32 %v620_v45, %v525_v43  ;;  %v1037_v53 = vpop.eup %1036 }
  0xed   : > { %v598_v50 = vpop.f32.mrf.mxu0 }
  0xee   : > { %1038 = vtanh.f32 %v621_v48  ;;  %v599_v9 = vadd.f32 %v598_v50, %v516_v2 }
  0xef   : > { %1040 = vtanh.f32 %v614_v44 }
  0xf0   : > { %1042 = vtanh.f32 %v616_v47 }
  0xf1   : > { %1044 = vtanh.f32 %v609_v51 }
  0xf2   : > { %1046 = vtanh.f32 %v611_v52 }
  0xf4   : > { %v1039_v54 = vpop.eup %1038 }
  0xf5   : > { %v1041_v55 = vpop.eup %1040  ;;  %v600_v56 = vpop.f32.mrf.mxu0  ;;  %v662_v57 = vpack.c.bf16 %v1039_v54, %v1037_v53  ;;  %v677_v54 = vld [vmem:[%s1546_s7 + $0x70] sm:$0xff] }
  0xf6   : > { %v1043_v58 = vpop.eup %1042  ;;  %v601_v4 = vadd.f32 %v600_v56, %v517_v63  ;;  %v675_v56 = vld [vmem:[%s1546_s7 + $0x60] sm:$0xff]  ;;  %v674_v63 = vld [vmem:[%s1546_s7 + $0x58] sm:$0xff] }
  0xf7   : > { %727 = vmatpush.bf16.msra.mxu1 %v662_v57  ;;  %984 = vmatpush.bf16.msra.mxu2 %v662_v57  ;;  %v1045_v59 = vpop.eup %1044  ;;  %v661_v60 = vpack.c.bf16 %v1043_v58, %v1041_v55  ;;  %v676_v58 = vld [vmem:[%s1546_s7 + $0x68] sm:$0xff] }
  0xf8   : > { %v1047_v61 = vpop.eup %1046 }
  0xf9   : > { %v660_v7 = vpack.c.bf16 %v1047_v61, %v1045_v59  ;;  %v678_v59 = vld [vmem:[%s1546_s7 + $0x78] sm:$0xff] }
  0xfb   : > { %728 = vmatpush.bf16.msra.mxu1 %v661_v60  ;;  %985 = vmatpush.bf16.msra.mxu2 %v661_v60 }
  0xfd   : > { %v603_v6 = vpop.f32.mrf.mxu0 }
  0xfe   : > { %v604_v0 = vadd.f32 %v603_v6, %v518_v62  ;;  %v673_v6 = vld [vmem:[%s1546_s7 + $0x50] sm:$0xff] }
  0xff   : > { %729 = vmatpush.bf16.msra.mxu1 %v660_v7  ;;  %986 = vmatpush.bf16.msra.mxu2 %v660_v7 }
 0x100   : > { %1048 = vtanh.f32 %v604_v0 }
 0x105   : > { %v605_v3 = vpop.f32.mrf.mxu0 }
 0x106   : > { %v606_v5 = vadd.f32 %v605_v3, %v519_v1  ;;  %v1049_v14 = vpop.eup %1048 }
 0x108   : > { %1050 = vtanh.f32 %v606_v5 }
 0x109   : > { %1052 = vtanh.f32 %v601_v4 }
 0x10a   : > { %1054 = vtanh.f32 %v599_v9 }
 0x10b   : > { %1056 = vtanh.f32 %v596_v11 }
 0x10c   : > { %1058 = vtanh.f32 %v594_v13 }
 0x10d   : > { %1060 = vtanh.f32 %v591_v17  ;;  %v670_v17 = vld [vmem:[%s1546_s7 + $0x38] sm:$0xff] }
 0x10e   : > { %v1051_v16 = vpop.eup %1050  ;;  %1062 = vtanh.f32 %v589_v20  ;;  %v669_v20 = vld [vmem:[%s1546_s7 + $0x30] sm:$0xff] }
 0x10f   : > { %v659_v18 = vpack.c.bf16 %v1051_v16, %v1049_v14  ;;  %v1053_v19 = vpop.eup %1052  ;;  %v671_v16 = vld [vmem:[%s1546_s7 + $0x40] sm:$0xff] }
 0x110   : > { %v1055_v21 = vpop.eup %1054 }
 0x111   : > { %730 = vmatpush.bf16.msra.mxu1 %v659_v18  ;;  %987 = vmatpush.bf16.msra.mxu2 %v659_v18  ;;  %v658_v22 = vpack.c.bf16 %v1053_v19, %v1055_v21  ;;  %v1057_v23 = vpop.eup %1056  ;;  %v672_v19 = vld [vmem:[%s1546_s7 + $0x48] sm:$0xff] }
 0x112   : > { %v1059_v24 = vpop.eup %1058 }
 0x113   : > { %v657_v25 = vpack.c.bf16 %v1057_v23, %v1059_v24  ;;  %v1061_v26 = vpop.eup %1060  ;;  %v668_v24 = vld [vmem:[%s1546_s7 + $0x28] sm:$0xff] }
 0x114   : > { %v1063_v27 = vpop.eup %1062 }
 0x115   : > { %731 = vmatpush.bf16.msra.mxu1 %v658_v22  ;;  %988 = vmatpush.bf16.msra.mxu2 %v658_v22  ;;  %v656_v28 = vpack.c.bf16 %v1061_v26, %v1063_v27  ;;  %v667_v26 = vld [vmem:[%s1546_s7 + $0x20] sm:$0xff] }
 0x119   : > { %732 = vmatpush.bf16.msra.mxu1 %v657_v25  ;;  %989 = vmatpush.bf16.msra.mxu2 %v657_v25 }
 0x11d   : > { %733 = vmatpush.bf16.msra.mxu1 %v656_v28  ;;  %990 = vmatpush.bf16.msra.mxu2 %v656_v28  ;;  %v666_v28 = vld [vmem:[%s1546_s7 + $0x18] sm:$0xff] }
 0x121   : > { %734 = vmatpush.bf16.msra.mxu1 %v1391_v32  ;;  %991 = vmatpush.bf16.msra.mxu2 %v1391_v32  ;;  %v975_v32 = vld [vmem:[%s1545_s6 + $0x38] sm:$0xff] }
 0x124   : > { %735 = vmatmul.bf16.vlgmr.msra.gmra.mxu1 %v968_v29  ;;  %760 = vmatmul.bf16.vlgmr.msra.gmra.mxu2 %v973_v30 }
 0x134   : > { %740 = vmatmul.bf16.gmra.mxu1 %v969_v31  ;;  %765 = vmatmul.bf16.gmra.mxu2 %v974_v33  ;;  %v665_v31 = vld [vmem:[%s1546_s7 + $0x10] sm:$0xff] }
 0x144   : > { %745 = vmatmul.bf16.gmra.mxu1 %v970_v34  ;;  %770 = vmatmul.bf16.gmra.mxu2 %v975_v32 }
 0x154   : > { %750 = vmatmul.bf16.gmra.mxu1 %v971_v35 }
 0x164   : > { %755 = vmatmul.bf16.gmra.mxu1 %v972_v36 }
 0x1a1   : > { %v736_v37 = vpop.f32.mrf.mxu1 }
 0x1a2   : > { %v737_v39 = vadd.f32 %v736_v37, %v663_v38 }
 0x1a4   : > { %1064 = vtanh.f32 %v737_v39 }
 0x1a7   : > { %v761_v40 = vpop.f32.mrf.mxu2 }
 0x1a8   : > { %v762_v1 = vadd.f32 %v761_v40, %v673_v6 }
 0x1a9   : > { %v738_v42 = vpop.f32.mrf.mxu1 }
 0x1aa   : > { %v739_v43 = vadd.f32 %v738_v42, %v664_v41  ;;  %v1471_v45 = vpop.eup %1064 }
 0x1ac   : > { %1066 = vtanh.f32 %v739_v43 }
 0x1af   : > { %v763_v44 = vpop.f32.mrf.mxu2 }
 0x1b0   : > { %v764_v2 = vadd.f32 %v763_v44, %v674_v63 }
 0x1b1   : > { %v1473_v46 = vpop.f32.mrf.mxu1 }
 0x1b2   : > { %v1475_v47 = vpop.eup %1066  ;;  %v742_v36 = vadd.f32 %v1473_v46, %v665_v31  ;;  %v792_v46 = vld [vmem:[%s1547_s8] sm:$0x1] }
 0x1b3   : > { %v793_v48 = vpack.c.bf16 %v1475_v47, %v1471_v45 }
 0x1b7   : > { %v766_v49 = vpop.f32.mrf.mxu2 }
 0x1b8   : > { %v767_v60 = vadd.f32 %v766_v49, %v675_v56  ;;  %v801_v49 = vld [vmem:[%s1548_s9] sm:$0x3] }
 0x1b9   : > { %v743_v50 = vpop.f32.mrf.mxu1 }
 0x1ba   : > { %v744_v34 = vadd.f32 %v743_v50, %v666_v28 }
 0x1bf   : > { %v768_v51 = vpop.f32.mrf.mxu2 }
 0x1c0   : > { %v769_v7 = vadd.f32 %v768_v51, %v676_v58 }
 0x1c1   : > { %v746_v52 = vpop.f32.mrf.mxu1 }
 0x1c2   : > { %v747_v29 = vadd.f32 %v746_v52, %v667_v26 }
 0x1c7   : > { %v771_v53 = vpop.f32.mrf.mxu2 }
 0x1c8   : > { %v772_v57 = vadd.f32 %v771_v53, %v677_v54 }
 0x1c9   : > { %v748_v55 = vpop.f32.mrf.mxu1 }
 0x1ca   : > { %1068 = vtanh.f32 %v772_v57  ;;  %v749_v27 = vadd.f32 %v748_v55, %v668_v24 }
 0x1cf   : > { %v773_v61 = vpop.f32.mrf.mxu2 }
 0x1d0   : > { %v774_v62 = vadd.f32 %v773_v61, %v678_v59  ;;  %v1069_v3 = vpop.eup %1068 }
 0x1d1   : > { %v751_v0 = vpop.f32.mrf.mxu1 }
 0x1d2   : > { %1070 = vtanh.f32 %v774_v62  ;;  %v752_v25 = vadd.f32 %v751_v0, %v669_v20 }
 0x1d3   : > { %1072 = vtanh.f32 %v767_v60 }
 0x1d4   : > { %1074 = vtanh.f32 %v769_v7 }
 0x1d5   : > { %1076 = vtanh.f32 %v762_v1 }
 0x1d6   : > { %1078 = vtanh.f32 %v764_v2 }
 0x1d8   : > { %v1071_v4 = vpop.eup %1070 }
 0x1d9   : > { %v1073_v5 = vpop.eup %1072  ;;  %v753_v8 = vpop.f32.mrf.mxu1  ;;  %v800_v9 = vpack.c.bf16 %v1071_v4, %v1069_v3 }
 0x1da   : > { %v1075_v10 = vpop.eup %1074  ;;  %v754_v22 = vadd.f32 %v753_v8, %v670_v17 }
 0x1db   : > { %802 = vmatpush.bf16.msrb.mxu2 %v800_v9  ;;  %v1077_v11 = vpop.eup %1076  ;;  %v799_v12 = vpack.c.bf16 %v1075_v10, %v1073_v5 }
 0x1dc   : > { %v1079_v13 = vpop.eup %1078 }
 0x1dd   : > { %v798_v15 = vpack.c.bf16 %v1079_v13, %v1077_v11 }
 0x1df   : > { %803 = vmatpush.bf16.msrb.mxu2 %v799_v12 }
 0x1e1   : > { %v756_v14 = vpop.f32.mrf.mxu1 }
 0x1e2   : > { %v757_v18 = vadd.f32 %v756_v14, %v671_v16 }
 0x1e3   : > { %804 = vmatpush.bf16.msrb.mxu2 %v798_v15 }
 0x1e4   : > { %1080 = vtanh.f32 %v757_v18 }
 0x1e9   : > { %v758_v21 = vpop.f32.mrf.mxu1 }
 0x1ea   : > { %v759_v23 = vadd.f32 %v758_v21, %v672_v19  ;;  %v1081_v30 = vpop.eup %1080 }
 0x1ec   : > { %1082 = vtanh.f32 %v759_v23 }
 0x1ed   : > { %1084 = vtanh.f32 %v754_v22 }
 0x1ee   : > { %1086 = vtanh.f32 %v752_v25 }
 0x1ef   : > { %1088 = vtanh.f32 %v749_v27 }
 0x1f0   : > { %1090 = vtanh.f32 %v747_v29 }
 0x1f1   : > { %1092 = vtanh.f32 %v744_v34 }
 0x1f2   : > { %v1083_v33 = vpop.eup %1082  ;;  %1094 = vtanh.f32 %v742_v36 }
 0x1f3   : > { %v797_v32 = vpack.c.bf16 %v1083_v33, %v1081_v30  ;;  %v1085_v35 = vpop.eup %1084 }
 0x1f4   : > { %v1087_v37 = vpop.eup %1086 }
 0x1f5   : > { %805 = vmatpush.bf16.msrb.mxu2 %v797_v32  ;;  %v796_v38 = vpack.c.bf16 %v1085_v35, %v1087_v37  ;;  %v1089_v39 = vpop.eup %1088 }
 0x1f6   : > { %v1091_v40 = vpop.eup %1090 }
 0x1f7   : > { %v795_v41 = vpack.c.bf16 %v1089_v39, %v1091_v40  ;;  %v1093_v42 = vpop.eup %1092 }
 0x1f8   : > { %v1095_v43 = vpop.eup %1094 }
 0x1f9   : > { %806 = vmatpush.bf16.msrb.mxu2 %v796_v38  ;;  %v794_v44 = vpack.c.bf16 %v1093_v42, %v1095_v43 }
 0x1fd   : > { %807 = vmatpush.bf16.msrb.mxu2 %v795_v41 }
 0x201   : > { %808 = vmatpush.bf16.msrb.mxu2 %v794_v44 }
 0x205   : > { %809 = vmatpush.bf16.msrb.mxu2 %v793_v48 }
 0x208   : > { %810 = vmatmul.bf16.vlgmr.msrb.gmra.mxu2 %v792_v46 }
 0x28b   : > { %v811_v50 = vpop.f32.mrf.mxu2 }
 0x28c   : > { %v812_v51 = vadd.f32 %v811_v50, %v801_v49 }
 0x28e   : > { %v818_v52 = vand.u32 2147483647, %v812_v51  ;;  %v815_v61 = vmax.f32 %v812_v51, 0.0  ;;  %vm816_vm1 = vcmp.ne.f32.partialorder %v812_v51, %v812_v51 }
 0x290   : > { %v819_v53 = vsub.f32 0.0, %v818_v52 }
 0x292   : > { %v820_v54 = vmul.f32 1.442695, %v819_v53 }
 0x293   : > { %v813_v55 = vpop.f32.mrf.mxu2 }
 0x294   : > { %1096 = vpow2.f32 %v820_v54 }
 0x29a   : > { %v1097_v56 = vpop.eup %1096 }
 0x29b   : > { %v822_v45 = vadd.f32 1.0, %v1097_v56  ;;  %v825_v47 = vmul.f32 -0.5, %v1097_v56  ;;  %v828_v57 = vand.u32 2147483647, %v1097_v56 }
 0x29d   : > { %1098 = vlog2.f32 %v822_v45  ;;  %v826_v48 = vadd.f32 1.0, %v825_v47  ;;  %vm829_vm0 = vcmp.lt.f32.partialorder %v828_v57, 0.0004427343 }
 0x29f   : > { %v827_v60 = vmul.f32 %v1097_v56, %v826_v48 }
 0x2a3   : > { %v1099_v58 = vpop.eup %1098 }
 0x2a4   : > { %v824_v59 = vmul.f32 0.6931472, %v1099_v58 }
 0x2a6   : > { %v830_v6 = vsel %vm829_vm0, %v827_v60, %v824_v59 }
 0x2a7   : > { %v831_v7 = vadd.f32 %v830_v6, %v815_v61 }
 0x2a9   : > { %v832_v62 = vsel %vm816_vm1, %v812_v51, %v831_v7 }
 0x2aa   : > { %833 = vst [vmem:[%s354_s30] sm:$0x3] %v832_v62 }
 0x2ab PF: > { %s20_s13 = sadd.s32 1, %s1106_s13  }
 0x2ac   : > { %p17_p4 = scmp.ge.s32.totalorder %s20_s13, 4  }
 0x2ae   :  { %19 = sbr.rel (!%p17_p4) target bundleno = 1 (0x1), region = 90 }

</bundles_post_ra>
